<compile_context>
chip_gen: v7x
topology: tpu7x:2x2x1
jax: 0.10.0
libtpu: 0.0.40
codegen_flags: <defaults>
</compile_context>

<pallas_src>
import functools

import jax
import jax.numpy as jnp
from jax import lax
from jax.experimental import pallas as pl
from jax.experimental.pallas import tpu as pltpu


# ----------------------------- fused kernel -------------------------------- #
def attention_transformer_kernel(a_ref, priors_ref, w_ref, b_ref,
                                 gamma_ref, beta_ref, r_ref,
                                 mask_ref, priors_out_ref, *, eps):
    # a_ref:      (chunk, inp_dim)   one ghost batch of rows
    # priors_ref: (chunk, out_dim)
    # w_ref:      (inp_dim, out_dim) full weight, resident in VMEM
    # b/gamma/beta: (1, out_dim);  r_ref: (1, 1) relax scalar
    x = a_ref[...].astype(jnp.float32)

    # fc: x @ W + b  (MXU, f32 accumulation)
    y = jnp.dot(x, w_ref[...], preferred_element_type=jnp.float32) + b_ref[...]

    # Ghost batch norm: training-mode batch statistics over this chunk's rows
    # (biased variance, eps=1e-5 — matches nn.BatchNorm1d normalization).
    mean = jnp.mean(y, axis=0, keepdims=True)
    cen = y - mean
    var = jnp.mean(cen * cen, axis=0, keepdims=True)
    a_bn = cen * lax.rsqrt(var + eps) * gamma_ref[...] + beta_ref[...]

    # mask = sigmoid(a * priors);  priors' = priors * (r - mask)
    priors = priors_ref[...].astype(jnp.float32)
    mask = jax.nn.sigmoid(a_bn * priors)
    new_priors = priors * (r_ref[0, 0] - mask)

    mask_ref[...] = mask.astype(mask_ref.dtype)
    priors_out_ref[...] = new_priors.astype(priors_out_ref.dtype)


def attention_transformer_forward(params, a, priors, *, vbs=128, eps=1e-5):
    """a: [B, inp_dim], priors: [B, out_dim] -> (mask, new_priors), both [B, out_dim]."""
    B, inp_dim = a.shape
    out_dim = params["w"].shape[1]

    # torch.chunk(x, max(1, B // vbs)) -> equal-size ghost batches of `chunk` rows.
    n_chunks = max(1, B // vbs)
    chunk = -(-B // n_chunks)  # ceil
    # TODO(synk): torch.chunk allows a smaller last chunk when B % n_chunks != 0;
    # this kernel assumes equal-size ghost batches.
    assert n_chunks * chunk == B, "B must split into equal-size ghost batches"

    kern = functools.partial(attention_transformer_kernel, eps=eps)

    b2d = params["b"].reshape(1, out_dim)
    g2d = params["gamma"].reshape(1, out_dim)
    be2d = params["beta"].reshape(1, out_dim)
    r2d = params["r"].reshape(1, 1)

    mask, new_priors = pl.pallas_call(
        kern,
        out_shape=(jax.ShapeDtypeStruct((B, out_dim), a.dtype),
                   jax.ShapeDtypeStruct((B, out_dim), priors.dtype)),
        grid=(n_chunks,),
        in_specs=[
            pl.BlockSpec((chunk, inp_dim), lambda i: (i, 0)),   # a (one ghost batch)
            pl.BlockSpec((chunk, out_dim), lambda i: (i, 0)),   # priors
            pl.BlockSpec((inp_dim, out_dim), lambda i: (0, 0)),  # W (resident)
            pl.BlockSpec((1, out_dim), lambda i: (0, 0)),        # bias
            pl.BlockSpec((1, out_dim), lambda i: (0, 0)),        # gamma
            pl.BlockSpec((1, out_dim), lambda i: (0, 0)),        # beta
            pl.BlockSpec((1, 1), lambda i: (0, 0)),              # relax
        ],
        out_specs=(pl.BlockSpec((chunk, out_dim), lambda i: (i, 0)),
                   pl.BlockSpec((chunk, out_dim), lambda i: (i, 0))),
        compiler_params=pltpu.CompilerParams(dimension_semantics=("parallel",)),
    )(a, priors, params["w"], b2d, g2d, be2d, r2d)
    return mask, new_priors


# --------------------------- parameter init --------------------------------- #
def init_attention_transformer_params(key, inp_dim, out_dim, relax):
    kw, kb = jax.random.split(key)
    scale = 1.0 / jnp.sqrt(inp_dim)
    # weight stored as [inp_dim, out_dim] (transposed vs. torch's [out, in])
    w = jax.random.uniform(kw, (inp_dim, out_dim), jnp.float32, -scale, scale)
    b = jax.random.uniform(kb, (out_dim,), jnp.float32, -scale, scale)
    gamma = jnp.ones((out_dim,), jnp.float32)   # BatchNorm1d weight
    beta = jnp.zeros((out_dim,), jnp.float32)   # BatchNorm1d bias
    r = jnp.asarray(relax, jnp.float32)
    return dict(w=w, b=b, gamma=gamma, beta=beta, r=r)


# ------------------------------- main ---------------------------------------- #
if __name__ == "__main__":
    inp_dim, out_dim = 32, 16
    relax = 1.3
    vbs = 128
    B = 256  # two ghost batches of 128 rows

    key = jax.random.PRNGKey(0)
    k_param, k_a, k_p = jax.random.split(key, 3)
    params = init_attention_transformer_params(k_param, inp_dim, out_dim, relax)
    a = jax.random.normal(k_a, (B, inp_dim), jnp.float32)
    priors = jax.random.uniform(k_p, (B, out_dim), jnp.float32, 0.5, 1.5)

    mask, new_priors = attention_transformer_forward(params, a, priors, vbs=vbs)
    mask = jax.block_until_ready(mask)
    new_priors = jax.block_until_ready(new_priors)

    # sanity check vs. pure-JAX reference
    def ref_forward(p, a_, priors_, vbs_, eps=1e-5):
        y = a_ @ p["w"] + p["b"]
        n_chunks = max(1, a_.shape[0] // vbs_)
        outs = []
        for c in jnp.split(y, n_chunks, axis=0):
            m = c.mean(0, keepdims=True)
            v = ((c - m) ** 2).mean(0, keepdims=True)
            outs.append((c - m) / jnp.sqrt(v + eps) * p["gamma"] + p["beta"])
        a_bn = jnp.concatenate(outs, 0)
        msk = jax.nn.sigmoid(a_bn * priors_)
        return msk, priors_ * (p["r"] - msk)

    ref_mask, ref_priors = ref_forward(params, a, priors, vbs)
    assert mask.shape == (B, out_dim) and new_priors.shape == (B, out_dim)
    assert jnp.allclose(mask, ref_mask, atol=1e-4, rtol=1e-4)
    assert jnp.allclose(new_priors, ref_priors, atol=1e-4, rtol=1e-4)
    print("KERNEL_OK")
</pallas_src>

<mosaic_0001>
module attributes {stable_mosaic.version = 11 : i64} {
  func.func @attention_transformer_kernel(%arg0: i32, %arg1: memref<128x32xf32, #tpu.memory_space<vmem>>, %arg2: memref<128x16xf32, #tpu.memory_space<vmem>>, %arg3: memref<32x16xf32, #tpu.memory_space<vmem>>, %arg4: memref<1x16xf32, #tpu.memory_space<vmem>>, %arg5: memref<1x16xf32, #tpu.memory_space<vmem>>, %arg6: memref<1x16xf32, #tpu.memory_space<vmem>>, %arg7: memref<1x1xf32, #tpu.memory_space<vmem>>, %arg8: memref<128x16xf32, #tpu.memory_space<vmem>>, %arg9: memref<128x16xf32, #tpu.memory_space<vmem>>) attributes {dimension_semantics = [#tpu.dimension_semantics<parallel>], iteration_bounds = array<i64: 2>, scalar_prefetch = 0 : i64, scratch_operands = 0 : i64, tpu.core_type = #tpu.core_type<tc>, window_params = [{transform_indices = @transform_0, window_bounds = array<i64: 128, 32>}, {transform_indices = @transform_1, window_bounds = array<i64: 128, 16>}, {pipeline_mode = #tpu.pipeline_mode<synchronous>, transform_indices = @transform_2, window_bounds = array<i64: 32, 16>}, {pipeline_mode = #tpu.pipeline_mode<synchronous>, transform_indices = @transform_3, window_bounds = array<i64: 1, 16>}, {pipeline_mode = #tpu.pipeline_mode<synchronous>, transform_indices = @transform_4, window_bounds = array<i64: 1, 16>}, {pipeline_mode = #tpu.pipeline_mode<synchronous>, transform_indices = @transform_5, window_bounds = array<i64: 1, 16>}, {pipeline_mode = #tpu.pipeline_mode<synchronous>, transform_indices = @transform_6, window_bounds = array<i64: 1, 1>}, {transform_indices = @transform_7, window_bounds = array<i64: 128, 16>}, {transform_indices = @transform_8, window_bounds = array<i64: 128, 16>}]} {
    %c0 = arith.constant 0 : index
    %c0_0 = arith.constant 0 : index
    %0 = vector.load %arg1[%c0, %c0_0] : memref<128x32xf32, #tpu.memory_space<vmem>>, vector<128x32xf32>
    %c0_1 = arith.constant 0 : index
    %c0_2 = arith.constant 0 : index
    %1 = vector.load %arg3[%c0_1, %c0_2] : memref<32x16xf32, #tpu.memory_space<vmem>>, vector<32x16xf32>
    %cst = arith.constant dense<0.000000e+00> : vector<128x16xf32>
    %2 = tpu.matmul %0, %1, %cst {dimension_numbers = #tpu.dot_dimension_numbers<[1], [0], [0], [1], [0, 0, 1, 1], [], []>} : vector<128x32xf32>, vector<32x16xf32>, vector<128x16xf32> -> vector<128x16xf32>
    %c0_3 = arith.constant 0 : index
    %c0_4 = arith.constant 0 : index
    %3 = vector.load %arg4[%c0_3, %c0_4] : memref<1x16xf32, #tpu.memory_space<vmem>>, vector<1x16xf32>
    %4 = vector.broadcast %3 : vector<1x16xf32> to vector<128x16xf32>
    %5 = arith.addf %2, %4 : vector<128x16xf32>
    %cst_5 = arith.constant dense<0.000000e+00> : vector<16xf32>
    %6 = vector.multi_reduction <add>, %5, %cst_5 [0] : vector<128x16xf32> to vector<16xf32>
    %7 = vector.shape_cast %6 : vector<16xf32> to vector<1x16xf32>
    %cst_6 = arith.constant 1.280000e+02 : f32
    %8 = vector.broadcast %cst_6 : f32 to vector<1x16xf32>
    %9 = arith.divf %7, %8 : vector<1x16xf32>
    %10 = vector.broadcast %9 : vector<1x16xf32> to vector<128x16xf32>
    %11 = arith.subf %5, %10 : vector<128x16xf32>
    %12 = arith.mulf %11, %11 : vector<128x16xf32>
    %cst_7 = arith.constant dense<0.000000e+00> : vector<16xf32>
    %13 = vector.multi_reduction <add>, %12, %cst_7 [0] : vector<128x16xf32> to vector<16xf32>
    %14 = vector.shape_cast %13 : vector<16xf32> to vector<1x16xf32>
    %cst_8 = arith.constant 1.280000e+02 : f32
    %15 = vector.broadcast %cst_8 : f32 to vector<1x16xf32>
    %16 = arith.divf %14, %15 : vector<1x16xf32>
    %cst_9 = arith.constant 9.99999974E-6 : f32
    %17 = vector.broadcast %cst_9 : f32 to vector<1x16xf32>
    %18 = arith.addf %16, %17 : vector<1x16xf32>
    %19 = math.rsqrt %18 : vector<1x16xf32>
    %20 = vector.broadcast %19 : vector<1x16xf32> to vector<128x16xf32>
    %21 = arith.mulf %11, %20 : vector<128x16xf32>
    %c0_10 = arith.constant 0 : index
    %c0_11 = arith.constant 0 : index
    %22 = vector.load %arg5[%c0_10, %c0_11] : memref<1x16xf32, #tpu.memory_space<vmem>>, vector<1x16xf32>
    %23 = vector.broadcast %22 : vector<1x16xf32> to vector<128x16xf32>
    %24 = arith.mulf %21, %23 : vector<128x16xf32>
    %c0_12 = arith.constant 0 : index
    %c0_13 = arith.constant 0 : index
    %25 = vector.load %arg6[%c0_12, %c0_13] : memref<1x16xf32, #tpu.memory_space<vmem>>, vector<1x16xf32>
    %26 = vector.broadcast %25 : vector<1x16xf32> to vector<128x16xf32>
    %27 = arith.addf %24, %26 : vector<128x16xf32>
    %c0_14 = arith.constant 0 : index
    %c0_15 = arith.constant 0 : index
    %28 = vector.load %arg2[%c0_14, %c0_15] : memref<128x16xf32, #tpu.memory_space<vmem>>, vector<128x16xf32>
    %29 = arith.mulf %27, %28 : vector<128x16xf32>
    %30 = arith.negf %29 : vector<128x16xf32>
    %31 = math.exp %30 : vector<128x16xf32>
    %cst_16 = arith.constant 1.000000e+00 : f32
    %32 = vector.broadcast %cst_16 : f32 to vector<128x16xf32>
    %33 = arith.addf %32, %31 : vector<128x16xf32>
    %34 = arith.divf %32, %33 : vector<128x16xf32>
    %c0_17 = arith.constant 0 : index
    %c0_18 = arith.constant 0 : index
    %35 = vector.load %arg7[%c0_17, %c0_18] : memref<1x1xf32, #tpu.memory_space<vmem>>, vector<1x1xf32>
    %36 = vector.extract %35[0, 0] : f32 from vector<1x1xf32>
    %37 = vector.broadcast %36 : f32 to vector<128x16xf32>
    %38 = arith.subf %37, %34 : vector<128x16xf32>
    %39 = arith.mulf %28, %38 : vector<128x16xf32>
    %c0_19 = arith.constant 0 : index
    %c0_20 = arith.constant 0 : index
    %40 = vector.load %arg8[%c0_19, %c0_20] : memref<128x16xf32, #tpu.memory_space<vmem>>, vector<128x16xf32>
    tpu.vector_store %arg8[%c0_19, %c0_20], %34 {strides = array<i32>} : memref<128x16xf32, #tpu.memory_space<vmem>>, vector<128x16xf32>,
    %c0_21 = arith.constant 0 : index
    %c0_22 = arith.constant 0 : index
    %41 = vector.load %arg9[%c0_21, %c0_22] : memref<128x16xf32, #tpu.memory_space<vmem>>, vector<128x16xf32>
    tpu.vector_store %arg9[%c0_21, %c0_22], %39 {strides = array<i32>} : memref<128x16xf32, #tpu.memory_space<vmem>>, vector<128x16xf32>,
    return
  }
  func.func @transform_0(%arg0: i32) -> (i32, i32) {
    %c0_i32 = arith.constant 0 : i32
    %c0_i32_0 = arith.constant 0 : i32
    return %arg0, %c0_i32 : i32, i32
  }
  func.func @transform_1(%arg0: i32) -> (i32, i32) {
    %c0_i32 = arith.constant 0 : i32
    %c0_i32_0 = arith.constant 0 : i32
    return %arg0, %c0_i32 : i32, i32
  }
  func.func @transform_2(%arg0: i32) -> (i32, i32) {
    %c0_i32 = arith.constant 0 : i32
    %c0_i32_0 = arith.constant 0 : i32
    %c0_i32_1 = arith.constant 0 : i32
    return %c0_i32, %c0_i32_0 : i32, i32
  }
  func.func @transform_3(%arg0: i32) -> (i32, i32) {
    %c0_i32 = arith.constant 0 : i32
    %c0_i32_0 = arith.constant 0 : i32
    %c0_i32_1 = arith.constant 0 : i32
    return %c0_i32, %c0_i32_0 : i32, i32
  }
  func.func @transform_4(%arg0: i32) -> (i32, i32) {
    %c0_i32 = arith.constant 0 : i32
    %c0_i32_0 = arith.constant 0 : i32
    %c0_i32_1 = arith.constant 0 : i32
    return %c0_i32, %c0_i32_0 : i32, i32
  }
  func.func @transform_5(%arg0: i32) -> (i32, i32) {
    %c0_i32 = arith.constant 0 : i32
    %c0_i32_0 = arith.constant 0 : i32
    %c0_i32_1 = arith.constant 0 : i32
    return %c0_i32, %c0_i32_0 : i32, i32
  }
  func.func @transform_6(%arg0: i32) -> (i32, i32) {
    %c0_i32 = arith.constant 0 : i32
    %c0_i32_0 = arith.constant 0 : i32
    %c0_i32_1 = arith.constant 0 : i32
    return %c0_i32, %c0_i32_0 : i32, i32
  }
  func.func @transform_7(%arg0: i32) -> (i32, i32) {
    %c0_i32 = arith.constant 0 : i32
    %c0_i32_0 = arith.constant 0 : i32
    return %arg0, %c0_i32 : i32, i32
  }
  func.func @transform_8(%arg0: i32) -> (i32, i32) {
    %c0_i32 = arith.constant 0 : i32
    %c0_i32_0 = arith.constant 0 : i32
    return %arg0, %c0_i32 : i32, i32
  }
}

</mosaic_0001>

<bundles_post_ra>
// kernel: tpu_custom_call.1
= control target key start
LH: loop header
LB: loop body
LE: loop exit
PB: predicated region body
PF: predicated region fallthrough
CT: control target
= control target key end

     0   :  { %s1285_s29 = smov 0   ;;  %s1657_s0 = inlined_call_operand.vmem [shape: f32[256,32], index: 0, kind: input, shape index: {}]   ;;  %s1658_s1 = inlined_call_operand.vmem [shape: f32[256,16], index: 1, kind: input, shape index: {}]   ;;  %s1659_s2 = inlined_call_operand.vmem [shape: f32[32,16], index: 2, kind: input, shape index: {}]   ;;  %s1660_s3 = inlined_call_operand.vmem [shape: f32[1,16], index: 3, kind: input, shape index: {}]   ;;  %s1661_s4 = inlined_call_operand.vmem [shape: f32[1,16], index: 4, kind: input, shape index: {}]   ;;  %s1662_s5 = inlined_call_operand.vmem [shape: f32[1,16], index: 5, kind: input, shape index: {}]   ;;  %s1663_s6 = inlined_call_operand.<no memory space> [shape: f32[1,1], index: 6, kind: input, shape index: {}]   ;;  %s1664_s7 = inlined_call_operand.vmem [shape: f32[256,16], index: 7, kind: output, shape index: {0}]   ;;  %s1665_s8 = inlined_call_operand.vmem [shape: f32[256,16], index: 8, kind: output, shape index: {1}]  }
   0x1   :  { %v14_v0 = vstv %s1663_s6 }
   0x2   :  { %15 = vst [vmem:[#allocation2] sm:$0x1] %v14_v0 }
   0x3 LB: > { %s1039_s30 = sadd.s32 4294967295, %s1235_s29   ;;  %p1043_p0 = scmp.ge.s32.totalorder %s1235_s29, 1  ;;  %s1235_s29 = sphi %s1285_s29, %s21_s29  }
   0x4   : > { %p279_p1 = scmp.lt.s32.totalorder %s1235_s29, 3 }
   0x6   : > { %p280_p2 = pnand %p1043_p0, %p279_p1 }
   0x7   : > { %v363_v1 = vld [vmem:[%s1659_s2] sm:$0xff] (!%p280_p2)  ;;  %v364_v2 = vld [vmem:[%s1659_s2 + $0x8] sm:$0xff] (!%p280_p2)  ;;  %v365_v3 = vld [vmem:[%s1659_s2 + $0x10] sm:$0xff] (!%p280_p2)  ;;  %s1044_s14 = sshll.u32 (!%p280_p2), %s1039_s30, 4  ;;  %vm374_vm0 = vcmask (!%p280_p2), 261120   ;;  %vm568_vm1 = vcmask (!%p280_p2), 130048  }
   0x8   : > { %283 = sbr.rel (%p280_p2) target bundleno = 411 (0x19b), region = 48  ;;  %v1141_v4 = vpack.c.bf16 (!%p280_p2), %v364_v2, %v363_v1  ;;  %v366_v5 = vld [vmem:[%s1659_s2 + $0x18] sm:$0xff] (!%p280_p2)  ;;  %p324_p3 = scmp.lt.s32.totalorder (!%p280_p2), %s1044_s14, 31  ;;  %v1052_v24 = vld [vmem:[%s1660_s3] ss:$0 sm:$0xff] (!%p280_p2) }
   0x9   : > { %v1145_v6 = vpack.c.bf16 (!%p280_p2), %v366_v5, %v365_v3  ;;  %v870_v23 = vld [vmem:[#allocation2] sm:$0x1] (!%p280_p2) }
   0xa   : > { %1142 = vmatprep.subr.bf16.mxu0 (!%p280_p2), %v1141_v4  ;;  %1149 = vmatprep.subr.bf16.mxu1 (!%p280_p2), %v1141_v4  ;;  %1153 = vpush (!%p280_p2), %v870_v23 }
   0xb   : > { %1144 = vmatpush3.bf16.msra.mxu0 (!%p280_p2), %v1141_v4  ;;  %1151 = vmatpush3.bf16.msra.mxu1 (!%p280_p2), %v1141_v4 }
   0xc   : > { %1146 = vmatprep.subr.bf16.mxu0 (!%p280_p2), %v1145_v6  ;;  %1150 = vmatprep.subr.bf16.mxu1 (!%p280_p2), %v1145_v6 }
   0xf   : > { %s1667_s14 = smov (!%p324_p3, %s1044_s14), 31  ;;  %1148 = vmatpush3.bf16.msra.mxu0 %v1145_v6  ;;  %1152 = vmatpush3.bf16.msra.mxu1 %v1145_v6 }
  0x10   : > { %s1305_s17 = sshll.u32 %s1667_s14, 3 }
  0x11   : > { %s1311_s20 = scalar_lea.vmem %s1657_s0, %s1305_s17  ;;  %s1475_s27 = scalar_lea.vmem %s1658_s1, %s1305_s17 }
  0x12   : > { %v347_v7 = vld [vmem:[%s1311_s20] sm:$0xff]  ;;  %v348_v8 = vld [vmem:[%s1311_s20 + $0x8] sm:$0xff]  ;;  %v349_v9 = vld [vmem:[%s1311_s20 + $0x10] sm:$0xff]  ;;  %s1548_s11 = scalar_lea.vmem %s1664_s7, %s1305_s17  ;;  %s1559_s14 = scalar_lea.vmem %s1665_s8, %s1305_s17 }
  0x13   : > { %1117 = vmatprep.mubr.msk.f32.mxu0 %vm374_vm0, %v347_v7  ;;  %v355_v10 = vld [vmem:[%s1311_s20 + $0x40] sm:$0xff]  ;;  %v356_v11 = vld [vmem:[%s1311_s20 + $0x48] sm:$0xff]  ;;  %v357_v12 = vld [vmem:[%s1311_s20 + $0x50] sm:$0xff] }
  0x14   : > { %1129 = vmatprep.mubr.msk.f32.mxu1 %vm374_vm0, %v355_v10  ;;  %1118 = vmatmul.mubr.msk.f32.vlgmr.msra.gmra.mrb[0].mxu0 %vm374_vm0, %v348_v8  ;;  %v350_v13 = vld [vmem:[%s1311_s20 + $0x18] sm:$0xff]  ;;  %v351_v14 = vld [vmem:[%s1311_s20 + $0x20] sm:$0xff]  ;;  %v352_v17 = vld [vmem:[%s1311_s20 + $0x28] sm:$0xff] }
  0x15   : > { %1120 = vmatprep.mubr.msk.f32.mxu0 %vm374_vm0, %v349_v9  ;;  %1130 = vmatmul.mubr.msk.f32.vlgmr.msra.gmra.mrb[0].mxu1 %vm374_vm0, %v356_v11  ;;  %v358_v15 = vld [vmem:[%s1311_s20 + $0x58] sm:$0xff]  ;;  %v359_v16 = vld [vmem:[%s1311_s20 + $0x60] sm:$0xff]  ;;  %v353_v18 = vld [vmem:[%s1311_s20 + $0x30] sm:$0xff] }
  0x16   : > { %1132 = vmatprep.mubr.msk.f32.mxu1 %vm374_vm0, %v357_v12  ;;  %v360_v19 = vld [vmem:[%s1311_s20 + $0x68] sm:$0xff]  ;;  %v361_v20 = vld [vmem:[%s1311_s20 + $0x70] sm:$0xff]  ;;  %v354_v21 = vld [vmem:[%s1311_s20 + $0x38] sm:$0xff] }
  0x17   : > { %v362_v22 = vld [vmem:[%s1311_s20 + $0x78] sm:$0xff] }
  0x18   : > { %1121 = vmatmul.mubr.msk.f32.gmra.mrb[2].mxu0 %vm374_vm0, %v350_v13 }
  0x19   : > { %1123 = vmatprep.mubr.msk.f32.mxu0 %vm374_vm0, %v351_v14  ;;  %1133 = vmatmul.mubr.msk.f32.gmra.mrb[2].mxu1 %vm374_vm0, %v358_v15 }
  0x1a   : > { %1135 = vmatprep.mubr.msk.f32.mxu1 %vm374_vm0, %v359_v16 }
  0x1c   : > { %1124 = vmatmul.mubr.msk.f32.gmra.mrb[4].mxu0 %vm374_vm0, %v352_v17 }
  0x1d   : > { %1126 = vmatprep.mubr.msk.f32.mxu0 %vm374_vm0, %v353_v18  ;;  %1136 = vmatmul.mubr.msk.f32.gmra.mrb[4].mxu1 %vm374_vm0, %v360_v19 }
  0x1e   : > { %1138 = vmatprep.mubr.msk.f32.mxu1 %vm374_vm0, %v361_v20 }
  0x20   : > { %1127 = vmatmul.mubr.msk.f32.gmra.mrb[6].mxu0 %vm374_vm0, %v354_v21 }
  0x21   : > { %1139 = vmatmul.mubr.msk.f32.gmra.mrb[6].mxu1 %vm374_vm0, %v362_v22 }
  0x3b   : > { %s1154_s9 = spop %1153 }
  0xe7   : > { %v1119_v25 = vpop.f32.mrb[0].mxu0 }
  0xe8   : > { %v1348_v26 = vadd.f32 %v1119_v25, %v1052_v24  ;;  %v489_v27 = vpop.f32.mrb[1].mxu0  ;;  %v1131_v28 = vpop.f32.mrb[0].mxu1 }
  0xe9   : > { %v1350_v29 = vadd.f32 %v1052_v24, %v489_v27  ;;  %v529_v30 = vpop.f32.mrb[1].mxu1  ;;  %v535_v0 = vadd.f32 %v1131_v28, %v1052_v24 }
  0xea   : > { %v570_v31 = vsel %vm568_vm1, %v1348_v26, 0.0  ;;  %v530_v58 = vadd.f32 %v1052_v24, %v529_v30 }
  0xeb   : > { %v569_v32 = vsel %vm568_vm1, %v1350_v29, 0.0  ;;  %v1122_v33 = vpop.f32.mrb[2].mxu0  ;;  %v586_v5 = vsel %vm568_vm1, %v535_v0, 0.0 }
  0xec   : > { %v571_v34 = vadd.f32 %v570_v31, %v569_v32  ;;  %v499_v35 = vpop.f32.mrb[3].mxu0  ;;  %v1134_v36 = vpop.f32.mrb[2].mxu1  ;;  %v505_v37 = vadd.f32 %v1122_v33, %v1052_v24  ;;  %v584_v1 = vsel %vm568_vm1, %v530_v58, 0.0 }
  0xed   : > { %v500_v38 = vadd.f32 %v1052_v24, %v499_v35  ;;  %v539_v39 = vpop.f32.mrb[3].mxu1  ;;  %v545_v6 = vadd.f32 %v1134_v36, %v1052_v24 }
  0xee   : > { %v574_v45 = vsel %vm568_vm1, %v505_v37, 0.0  ;;  %v540_v2 = vadd.f32 %v1052_v24, %v539_v39 }
  0xef   : > { %v572_v40 = vsel %vm568_vm1, %v500_v38, 0.0  ;;  %v1125_v41 = vpop.f32.mrb[4].mxu0  ;;  %v590_v11 = vsel %vm568_vm1, %v545_v6, 0.0 }
  0xf0   : > { %v573_v42 = vadd.f32 %v572_v40, %v571_v34  ;;  %v509_v43 = vpop.f32.mrb[5].mxu0  ;;  %v1137_v44 = vpop.f32.mrb[4].mxu1  ;;  %v515_v46 = vadd.f32 %v1125_v41, %v1052_v24  ;;  %v588_v7 = vsel %vm568_vm1, %v540_v2, 0.0 }
  0xf1   : > { %v510_v47 = vadd.f32 %v1052_v24, %v509_v43  ;;  %v549_v48 = vpop.f32.mrb[5].mxu1  ;;  %v555_v12 = vadd.f32 %v1137_v44, %v1052_v24 }
  0xf2   : > { %v575_v49 = vadd.f32 %v574_v45, %v573_v42  ;;  %v578_v55 = vsel %vm568_vm1, %v515_v46, 0.0  ;;  %v550_v8 = vadd.f32 %v1052_v24, %v549_v48 }
  0xf3   : > { %v576_v50 = vsel %vm568_vm1, %v510_v47, 0.0  ;;  %v1128_v51 = vpop.f32.mrb[6].mxu0  ;;  %v594_v17 = vsel %vm568_vm1, %v555_v12, 0.0 }
  0xf4   : > { %v577_v52 = vadd.f32 %v576_v50, %v575_v49  ;;  %v519_v53 = vpop.f32.mrb[7].mxu0  ;;  %v1140_v54 = vpop.f32.mrb[6].mxu1  ;;  %v525_v56 = vadd.f32 %v1128_v51, %v1052_v24  ;;  %v592_v13 = vsel %vm568_vm1, %v550_v8, 0.0 }
  0xf5   : > { %v520_v57 = vadd.f32 %v1052_v24, %v519_v53  ;;  %v559_v59 = vpop.f32.mrb[7].mxu1  ;;  %v565_v18 = vadd.f32 %v1140_v54, %v1052_v24 }
  0xf6   : > { %v579_v60 = vadd.f32 %v578_v55, %v577_v52  ;;  %v582_v63 = vsel %vm568_vm1, %v525_v56, 0.0  ;;  %v560_v14 = vadd.f32 %v1052_v24, %v559_v59 }
  0xf7   : > { %v580_v61 = vsel %vm568_vm1, %v520_v57, 0.0  ;;  %v598_v22 = vsel %vm568_vm1, %v565_v18, 0.0 }
  0xf8   : > { %v581_v62 = vadd.f32 %v580_v61, %v579_v60  ;;  %v596_v19 = vsel %vm568_vm1, %v560_v14, 0.0 }
  0xfa   : > { %v583_v3 = vadd.f32 %v582_v63, %v581_v62 }
  0xfc   : > { %v585_v4 = vadd.f32 %v584_v1, %v583_v3 }
  0xfe   : > { %v587_v9 = vadd.f32 %v586_v5, %v585_v4 }
 0x100   : > { %v589_v10 = vadd.f32 %v588_v7, %v587_v9 }
 0x102   : > { %v591_v15 = vadd.f32 %v590_v11, %v589_v10 }
 0x104   : > { %v593_v16 = vadd.f32 %v592_v13, %v591_v15 }
 0x106   : > { %v595_v20 = vadd.f32 %v594_v17, %v593_v16 }
 0x108   : > { %v597_v21 = vadd.f32 %v596_v19, %v595_v20 }
 0x10a   : > { %v599_v23 = vadd.f32 %v598_v22, %v597_v21 }
 0x10c   : > { %v600_v25 = vrot.slane %v599_v23, 4 }
 0x10e   : > { %v601_v27 = vadd.f32 %v600_v25, %v599_v23 }
 0x110   : > { %v602_v28 = vrot.slane %v601_v27, 2 }
 0x112   : > { %v603_v30 = vadd.f32 %v602_v28, %v601_v27 }
 0x114   : > { %v604_v31 = vrot.slane %v603_v30, 1 }
 0x116   : > { %v605_v32 = vadd.f32 %v604_v31, %v603_v30 }
 0x118   : > { %v607_v33 = vmul.f32 0.0078125, %v605_v32 }
 0x11a   : > { %v1371_v34 = vsub.f32 %v1350_v29, %v607_v33  ;;  %v1374_v35 = vsub.f32 %v1348_v26, %v607_v33  ;;  %v1376_v24 = vsub.f32 %v500_v38, %v607_v33  ;;  %v1378_v36 = vsub.f32 %v505_v37, %v607_v33 }
 0x11b   : > { %v1380_v39 = vsub.f32 %v510_v47, %v607_v33  ;;  %v1382_v40 = vsub.f32 %v515_v46, %v607_v33  ;;  %v1384_v41 = vsub.f32 %v520_v57, %v607_v33  ;;  %v1386_v42 = vsub.f32 %v525_v56, %v607_v33 }
 0x11c   : > { %v1388_v43 = vsub.f32 %v530_v58, %v607_v33  ;;  %v1390_v44 = vsub.f32 %v535_v0, %v607_v33  ;;  %v1392_v29 = vsub.f32 %v540_v2, %v607_v33  ;;  %v1394_v26 = vsub.f32 %v545_v6, %v607_v33 }
 0x11d   : > { %v1396_v38 = vsub.f32 %v550_v8, %v607_v33  ;;  %v1398_v37 = vsub.f32 %v555_v12, %v607_v33  ;;  %v1400_v45 = vsub.f32 %v560_v14, %v607_v33  ;;  %v1402_v46 = vsub.f32 %v565_v18, %v607_v33 }
 0x11e   : > { %v624_v47 = vmul.f32 %v1371_v34, %v1371_v34  ;;  %v625_v48 = vmul.f32 %v1374_v35, %v1374_v35  ;;  %v626_v49 = vmul.f32 %v1376_v24, %v1376_v24  ;;  %v627_v50 = vmul.f32 %v1378_v36, %v1378_v36 }
 0x11f   : > { %v628_v54 = vmul.f32 %v1380_v39, %v1380_v39  ;;  %v629_v57 = vmul.f32 %v1382_v40, %v1382_v40  ;;  %v630_v60 = vmul.f32 %v1384_v41, %v1384_v41  ;;  %v631_v63 = vmul.f32 %v1386_v42, %v1386_v42 }
 0x120   : > { %v640_v51 = vsel %vm568_vm1, %v624_v47, 0.0  ;;  %v641_v52 = vsel %vm568_vm1, %v625_v48, 0.0  ;;  %v643_v55 = vsel %vm568_vm1, %v626_v49, 0.0  ;;  %v645_v58 = vsel %vm568_vm1, %v627_v50, 0.0 }
 0x121   : > { %v642_v53 = vadd.f32 %v641_v52, %v640_v51  ;;  %v647_v61 = vsel %vm568_vm1, %v628_v54, 0.0  ;;  %v649_v0 = vsel %vm568_vm1, %v629_v57, 0.0  ;;  %v632_v2 = vmul.f32 %v1388_v43, %v1388_v43 }
 0x122   : > { %v651_v3 = vsel %vm568_vm1, %v630_v60, 0.0  ;;  %v633_v5 = vmul.f32 %v1390_v44, %v1390_v44  ;;  %v653_v6 = vsel %vm568_vm1, %v631_v63, 0.0  ;;  %v634_v8 = vmul.f32 %v1392_v29, %v1392_v29  ;;  %v1069_v63 = vld [vmem:[%s1661_s4] ss:$0 sm:$0xff] }
 0x123   : > { %v644_v56 = vadd.f32 %v643_v55, %v642_v53  ;;  %v655_v9 = vsel %vm568_vm1, %v632_v2, 0.0  ;;  %v635_v11 = vmul.f32 %v1394_v26, %v1394_v26  ;;  %v636_v14 = vmul.f32 %v1396_v38, %v1396_v38 }
 0x124   : > { %v657_v12 = vsel %vm568_vm1, %v633_v5, 0.0  ;;  %v659_v15 = vsel %vm568_vm1, %v634_v8, 0.0  ;;  %v637_v17 = vmul.f32 %v1398_v37, %v1398_v37  ;;  %v638_v20 = vmul.f32 %v1400_v45, %v1400_v45 }
 0x125   : > { %v646_v59 = vadd.f32 %v645_v58, %v644_v56  ;;  %v661_v18 = vsel %vm568_vm1, %v635_v11, 0.0  ;;  %v663_v21 = vsel %vm568_vm1, %v636_v14, 0.0  ;;  %v639_v23 = vmul.f32 %v1402_v46, %v1402_v46  ;;  %v1484_v14 = vld [vmem:[%s1475_s27 + $0x8] sm:$0xff] }
 0x126   : > { %v665_v25 = vsel %vm568_vm1, %v637_v17, 0.0  ;;  %v667_v28 = vsel %vm568_vm1, %v638_v20, 0.0 }
 0x127   : > { %v648_v62 = vadd.f32 %v647_v61, %v646_v59  ;;  %v669_v31 = vsel %vm568_vm1, %v639_v23, 0.0  ;;  %v1499_v23 = vld [vmem:[%s1475_s27 + $0x30] sm:$0xff] }
 0x129   : > { %v650_v1 = vadd.f32 %v649_v0, %v648_v62 }
 0x12b   : > { %v652_v4 = vadd.f32 %v651_v3, %v650_v1 }
 0x12d   : > { %v654_v7 = vadd.f32 %v653_v6, %v652_v4 }
 0x12f   : > { %v656_v10 = vadd.f32 %v655_v9, %v654_v7  ;;  %v1481_v9 = vld [vmem:[%s1475_s27] sm:$0xff] }
 0x131   : > { %v658_v13 = vadd.f32 %v657_v12, %v656_v10 }
 0x133   : > { %v660_v16 = vadd.f32 %v659_v15, %v658_v13  ;;  %v1487_v15 = vld [vmem:[%s1475_s27 + $0x10] sm:$0xff] }
 0x135   : > { %v662_v19 = vadd.f32 %v661_v18, %v660_v16  ;;  %v1490_v16 = vld [vmem:[%s1475_s27 + $0x18] sm:$0xff] }
 0x137   : > { %v664_v22 = vadd.f32 %v663_v21, %v662_v19  ;;  %v1493_v21 = vld [vmem:[%s1475_s27 + $0x20] sm:$0xff] }
 0x139   : > { %v666_v27 = vadd.f32 %v665_v25, %v664_v22  ;;  %v1496_v22 = vld [vmem:[%s1475_s27 + $0x28] sm:$0xff] }
 0x13b   : > { %v668_v30 = vadd.f32 %v667_v28, %v666_v27 }
 0x13d   : > { %v670_v32 = vadd.f32 %v669_v31, %v668_v30  ;;  %v1502_v31 = vld [vmem:[%s1475_s27 + $0x38] sm:$0xff] }
 0x13f   : > { %v671_v33 = vrot.slane %v670_v32, 4 }
 0x141   : > { %v672_v47 = vadd.f32 %v671_v33, %v670_v32  ;;  %v1505_v32 = vld [vmem:[%s1475_s27 + $0x40] sm:$0xff]  ;;  %v1508_v33 = vld [vmem:[%s1475_s27 + $0x48] sm:$0xff] }
 0x143   : > { %v673_v48 = vrot.slane %v672_v47, 2 }
 0x145   : > { %v674_v49 = vadd.f32 %v673_v48, %v672_v47 }
 0x147   : > { %v675_v50 = vrot.slane %v674_v49, 1 }
 0x149   : > { %v676_v51 = vadd.f32 %v675_v50, %v674_v49 }
 0x14b   : > { %v677_v52 = vmul.f32 0.0078125, %v676_v51  ;;  %v1511_v51 = vld [vmem:[%s1475_s27 + $0x50] sm:$0xff] }
 0x14d   : > { %v678_v53 = vadd.f32 1e-05, %v677_v52  ;;  %v1514_v52 = vld [vmem:[%s1475_s27 + $0x58] sm:$0xff] }
 0x14f   : > { %1163 = vrsqrt.f32 %v678_v53  ;;  %v1517_v53 = vld [vmem:[%s1475_s27 + $0x60] sm:$0xff] }
 0x159   : > { %v1164_v54 = vpop.eup %1163 }
 0x15a   : > { %v680_v55 = vmul.f32 %v1164_v54, %v1371_v34  ;;  %v681_v56 = vmul.f32 %v1164_v54, %v1374_v35  ;;  %v682_v57 = vmul.f32 %v1164_v54, %v1376_v24  ;;  %v683_v58 = vmul.f32 %v1164_v54, %v1378_v36 }
 0x15b   : > { %v684_v59 = vmul.f32 %v1164_v54, %v1380_v39  ;;  %v685_v60 = vmul.f32 %v1164_v54, %v1382_v40  ;;  %v686_v61 = vmul.f32 %v1164_v54, %v1384_v41  ;;  %v687_v62 = vmul.f32 %v1164_v54, %v1386_v42 }
 0x15c   : > { %v688_v34 = vmul.f32 %v1164_v54, %v1388_v43  ;;  %v689_v35 = vmul.f32 %v1164_v54, %v1390_v44  ;;  %v690_v24 = vmul.f32 %v1164_v54, %v1392_v29  ;;  %v691_v36 = vmul.f32 %v1164_v54, %v1394_v26 }
 0x15d   : > { %v692_v39 = vmul.f32 %v1164_v54, %v1396_v38  ;;  %v693_v40 = vmul.f32 %v1164_v54, %v1398_v37  ;;  %v694_v41 = vmul.f32 %v1164_v54, %v1400_v45  ;;  %v695_v42 = vmul.f32 %v1164_v54, %v1402_v46  ;;  %v1070_v37 = vld [vmem:[%s1662_s5] ss:$0 sm:$0xff]  ;;  %v1520_v54 = vld [vmem:[%s1475_s27 + $0x68] sm:$0xff] }
 0x15e   : > { %v703_v43 = vmul.f32 %v1069_v63, %v680_v55  ;;  %v704_v0 = vmul.f32 %v1069_v63, %v681_v56  ;;  %v705_v44 = vmul.f32 %v1069_v63, %v682_v57  ;;  %v706_v29 = vmul.f32 %v1069_v63, %v683_v58  ;;  %v1523_v55 = vld [vmem:[%s1475_s27 + $0x70] sm:$0xff]  ;;  %v1526_v56 = vld [vmem:[%s1475_s27 + $0x78] sm:$0xff] }
 0x15f   : > { %v707_v1 = vmul.f32 %v1069_v63, %v684_v59  ;;  %v708_v26 = vmul.f32 %v1069_v63, %v685_v60  ;;  %v709_v2 = vmul.f32 %v1069_v63, %v686_v61  ;;  %v710_v38 = vmul.f32 %v1069_v63, %v687_v62 }
 0x160   : > { %v711_v45 = vmul.f32 %v1069_v63, %v688_v34  ;;  %v712_v46 = vmul.f32 %v1069_v63, %v689_v35  ;;  %v713_v3 = vmul.f32 %v1069_v63, %v690_v24  ;;  %v714_v4 = vmul.f32 %v1069_v63, %v691_v36 }
 0x161   : > { %v715_v5 = vmul.f32 %v1069_v63, %v692_v39  ;;  %v716_v6 = vmul.f32 %v1069_v63, %v693_v40  ;;  %v717_v7 = vmul.f32 %v1069_v63, %v694_v41  ;;  %v718_v8 = vmul.f32 %v1069_v63, %v695_v42 }
 0x162   : > { %v726_v10 = vadd.f32 %v1070_v37, %v703_v43  ;;  %v727_v11 = vadd.f32 %v1070_v37, %v704_v0  ;;  %v728_v12 = vadd.f32 %v1070_v37, %v705_v44  ;;  %v729_v13 = vadd.f32 %v1070_v37, %v706_v29 }
 0x163   : > { %v730_v17 = vadd.f32 %v1070_v37, %v707_v1  ;;  %v731_v18 = vadd.f32 %v1070_v37, %v708_v26  ;;  %v732_v19 = vadd.f32 %v1070_v37, %v709_v2  ;;  %v733_v20 = vadd.f32 %v1070_v37, %v710_v38 }
 0x164   : > { %v734_v25 = vadd.f32 %v1070_v37, %v711_v45  ;;  %v735_v27 = vadd.f32 %v1070_v37, %v712_v46  ;;  %v736_v28 = vadd.f32 %v1070_v37, %v713_v3  ;;  %v737_v30 = vadd.f32 %v1070_v37, %v714_v4 }
 0x165   : > { %v738_v47 = vadd.f32 %v1070_v37, %v715_v5  ;;  %v739_v48 = vadd.f32 %v1070_v37, %v716_v6  ;;  %v740_v49 = vadd.f32 %v1070_v37, %v717_v7  ;;  %v741_v50 = vadd.f32 %v1070_v37, %v718_v8 }
 0x166   : > { %v758_v57 = vmul.f32 %v1481_v9, %v726_v10  ;;  %v759_v58 = vmul.f32 %v1484_v14, %v727_v11  ;;  %v760_v59 = vmul.f32 %v1487_v15, %v728_v12  ;;  %v761_v60 = vmul.f32 %v1490_v16, %v729_v13 }
 0x167   : > { %v762_v61 = vmul.f32 %v1493_v21, %v730_v17  ;;  %v763_v62 = vmul.f32 %v1496_v22, %v731_v18  ;;  %v764_v63 = vmul.f32 %v1499_v23, %v732_v19  ;;  %v765_v34 = vmul.f32 %v1502_v31, %v733_v20 }
 0x168   : > { %v766_v35 = vmul.f32 %v1505_v32, %v734_v25  ;;  %v767_v24 = vmul.f32 %v1508_v33, %v735_v27  ;;  %v768_v36 = vmul.f32 %v1511_v51, %v736_v28  ;;  %v769_v39 = vmul.f32 %v1514_v52, %v737_v30 }
 0x169   : > { %v770_v40 = vmul.f32 %v1517_v53, %v738_v47  ;;  %v771_v41 = vmul.f32 %v1520_v54, %v739_v48  ;;  %v772_v42 = vmul.f32 %v1523_v55, %v740_v49  ;;  %v773_v43 = vmul.f32 %v1526_v56, %v741_v50 }
 0x16a   : > { %v1071_v0 = vmul.f32 -1.442695, %v758_v57  ;;  %v1072_v44 = vmul.f32 -1.442695, %v759_v58  ;;  %v1073_v29 = vmul.f32 -1.442695, %v760_v59 }
 0x16b   : > { %v1074_v1 = vmul.f32 -1.442695, %v761_v60  ;;  %v1075_v26 = vmul.f32 -1.442695, %v762_v61  ;;  %v1076_v2 = vmul.f32 -1.442695, %v763_v62 }
 0x16c   : > { %1165 = vpow2.f32 %v1071_v0  ;;  %v1077_v38 = vmul.f32 -1.442695, %v764_v63  ;;  %v1078_v37 = vmul.f32 -1.442695, %v765_v34  ;;  %v1079_v45 = vmul.f32 -1.442695, %v766_v35 }
 0x16d   : > { %1167 = vpow2.f32 %v1072_v44  ;;  %v1080_v46 = vmul.f32 -1.442695, %v767_v24  ;;  %v1081_v3 = vmul.f32 -1.442695, %v768_v36  ;;  %v1082_v4 = vmul.f32 -1.442695, %v769_v39 }
 0x16e   : > { %1169 = vpow2.f32 %v1073_v29  ;;  %v1083_v5 = vmul.f32 -1.442695, %v770_v40  ;;  %v1084_v6 = vmul.f32 -1.442695, %v771_v41  ;;  %v1085_v8 = vmul.f32 -1.442695, %v772_v42 }
 0x16f   : > { %1171 = vpow2.f32 %v1074_v1  ;;  %v1086_v11 = vmul.f32 -1.442695, %v773_v43  ;;  %v1550_v40 = vstv %s1154_s9 }
 0x170   : > { %1173 = vpow2.f32 %v1075_v26 }
 0x171   : > { %1175 = vpow2.f32 %v1076_v2 }
 0x172   : > { %1177 = vpow2.f32 %v1077_v38 }
 0x173   : > { %1179 = vpow2.f32 %v1078_v37 }
 0x174   : > { %1181 = vpow2.f32 %v1079_v45 }
 0x175   : > { %1183 = vpow2.f32 %v1080_v46 }
 0x176   : > { %v1166_v7 = vpop.eup %1165  ;;  %1185 = vpow2.f32 %v1081_v3 }
 0x177   : > { %v1168_v10 = vpop.eup %1167  ;;  %1187 = vpow2.f32 %v1082_v4  ;;  %v822_v13 = vadd.f32 1.0, %v1166_v7 }
 0x178   : > { %v1170_v12 = vpop.eup %1169  ;;  %1189 = vpow2.f32 %v1083_v5  ;;  %v823_v18 = vadd.f32 1.0, %v1168_v10 }
 0x179   : > { %v1172_v17 = vpop.eup %1171  ;;  %1191 = vpow2.f32 %v1084_v6  ;;  %v824_v20 = vadd.f32 1.0, %v1170_v12 }
 0x17a   : > { %v1174_v19 = vpop.eup %1173  ;;  %1193 = vpow2.f32 %v1085_v8  ;;  %v825_v27 = vadd.f32 1.0, %v1172_v17 }
 0x17b   : > { %v1176_v25 = vpop.eup %1175  ;;  %1195 = vpow2.f32 %v1086_v11  ;;  %v826_v30 = vadd.f32 1.0, %v1174_v19 }
 0x17c   : > { %v1178_v28 = vpop.eup %1177  ;;  %1197 = vrcp.f32 %v822_v13  ;;  %v827_v48 = vadd.f32 1.0, %v1176_v25 }
 0x17d   : > { %v1180_v47 = vpop.eup %1179  ;;  %1199 = vrcp.f32 %v823_v18  ;;  %v828_v50 = vadd.f32 1.0, %v1178_v28 }
 0x17e   : > { %v1182_v49 = vpop.eup %1181  ;;  %1201 = vrcp.f32 %v824_v20  ;;  %v829_v58 = vadd.f32 1.0, %v1180_v47 }
 0x17f   : > { %v1184_v57 = vpop.eup %1183  ;;  %1203 = vrcp.f32 %v825_v27  ;;  %v830_v60 = vadd.f32 1.0, %v1182_v49 }
 0x180   : > { %v1186_v59 = vpop.eup %1185  ;;  %1205 = vrcp.f32 %v826_v30  ;;  %v831_v62 = vadd.f32 1.0, %v1184_v57 }
 0x181   : > { %v1188_v61 = vpop.eup %1187  ;;  %1207 = vrcp.f32 %v827_v48  ;;  %v832_v34 = vadd.f32 1.0, %v1186_v59 }
 0x182   : > { %v1190_v63 = vpop.eup %1189  ;;  %1209 = vrcp.f32 %v828_v50  ;;  %v833_v24 = vadd.f32 1.0, %v1188_v61 }
 0x183   : > { %v1192_v35 = vpop.eup %1191  ;;  %1211 = vrcp.f32 %v829_v58  ;;  %v834_v39 = vadd.f32 1.0, %v1190_v63 }
 0x184   : > { %v1194_v36 = vpop.eup %1193  ;;  %1213 = vrcp.f32 %v830_v60  ;;  %v835_v42 = vadd.f32 1.0, %v1192_v35 }
 0x185   : > { %v1196_v41 = vpop.eup %1195  ;;  %1215 = vrcp.f32 %v831_v62  ;;  %v836_v0 = vadd.f32 1.0, %v1194_v36 }
 0x186   : > { %v1198_v43 = vpop.eup %1197  ;;  %1217 = vrcp.f32 %v832_v34  ;;  %v837_v29 = vadd.f32 1.0, %v1196_v41 }
 0x187   : > { %v1200_v44 = vpop.eup %1199  ;;  %1219 = vrcp.f32 %v833_v24  ;;  %905 = vst.msk [vmem:[%s1548_s11] sm:$0xff] %vm568_vm1, %v1198_v43  ;;  %v873_v1 = vsub.f32 %v1550_v40, %v1198_v43 }
 0x188   : > { %v1202_v26 = vpop.eup %1201  ;;  %1221 = vrcp.f32 %v834_v39  ;;  %906 = vst.msk [vmem:[%s1548_s11 + $0x8] sm:$0xff] %vm568_vm1, %v1200_v44  ;;  %v874_v2 = vsub.f32 %v1550_v40, %v1200_v44 }
 0x189   : > { %v1204_v38 = vpop.eup %1203  ;;  %1223 = vrcp.f32 %v835_v42  ;;  %907 = vst.msk [vmem:[%s1548_s11 + $0x10] sm:$0xff] %vm568_vm1, %v1202_v26  ;;  %v875_v37 = vsub.f32 %v1550_v40, %v1202_v26  ;;  %v889_v45 = vmul.f32 %v873_v1, %v1481_v9 }
 0x18a   : > { %v1206_v46 = vpop.eup %1205  ;;  %1225 = vrcp.f32 %v836_v0  ;;  %908 = vst.msk [vmem:[%s1548_s11 + $0x18] sm:$0xff] %vm568_vm1, %v1204_v38  ;;  %v876_v3 = vsub.f32 %v1550_v40, %v1204_v38  ;;  %v890_v4 = vmul.f32 %v874_v2, %v1484_v14 }
 0x18b   : > { %v1208_v5 = vpop.eup %1207  ;;  %1227 = vrcp.f32 %v837_v29  ;;  %909 = vst.msk [vmem:[%s1548_s11 + $0x20] sm:$0xff] %vm568_vm1, %v1206_v46  ;;  %v877_v6 = vsub.f32 %v1550_v40, %v1206_v46  ;;  %v891_v9 = vmul.f32 %v875_v37, %v1487_v15  ;;  %921 = vst.msk [vmem:[%s1559_s14] sm:$0xff] %vm568_vm1, %v889_v45 }
 0x18c   : > { %v1210_v7 = vpop.eup %1209  ;;  %910 = vst.msk [vmem:[%s1548_s11 + $0x28] sm:$0xff] %vm568_vm1, %v1208_v5  ;;  %v878_v8 = vsub.f32 %v1550_v40, %v1208_v5  ;;  %v892_v14 = vmul.f32 %v876_v3, %v1490_v16  ;;  %922 = vst.msk [vmem:[%s1559_s14 + $0x8] sm:$0xff] %vm568_vm1, %v890_v4 }
 0x18d   : > { %v1212_v10 = vpop.eup %1211  ;;  %911 = vst.msk [vmem:[%s1548_s11 + $0x30] sm:$0xff] %vm568_vm1, %v1210_v7  ;;  %v879_v15 = vsub.f32 %v1550_v40, %v1210_v7  ;;  %v893_v11 = vmul.f32 %v877_v6, %v1493_v21  ;;  %923 = vst.msk [vmem:[%s1559_s14 + $0x10] sm:$0xff] %vm568_vm1, %v891_v9 }
 0x18e   : > { %v1214_v12 = vpop.eup %1213  ;;  %912 = vst.msk [vmem:[%s1548_s11 + $0x38] sm:$0xff] %vm568_vm1, %v1212_v10  ;;  %v880_v16 = vsub.f32 %v1550_v40, %v1212_v10  ;;  %v894_v13 = vmul.f32 %v878_v8, %v1496_v22  ;;  %924 = vst.msk [vmem:[%s1559_s14 + $0x18] sm:$0xff] %vm568_vm1, %v892_v14 }
 0x18f   : > { %v1216_v17 = vpop.eup %1215  ;;  %913 = vst.msk [vmem:[%s1548_s11 + $0x40] sm:$0xff] %vm568_vm1, %v1214_v12  ;;  %v881_v21 = vsub.f32 %v1550_v40, %v1214_v12  ;;  %v895_v18 = vmul.f32 %v879_v15, %v1499_v23  ;;  %925 = vst.msk [vmem:[%s1559_s14 + $0x20] sm:$0xff] %vm568_vm1, %v893_v11 }
 0x190   : > { %v1218_v19 = vpop.eup %1217  ;;  %914 = vst.msk [vmem:[%s1548_s11 + $0x48] sm:$0xff] %vm568_vm1, %v1216_v17  ;;  %v882_v22 = vsub.f32 %v1550_v40, %v1216_v17  ;;  %v896_v20 = vmul.f32 %v880_v16, %v1502_v31  ;;  %926 = vst.msk [vmem:[%s1559_s14 + $0x28] sm:$0xff] %vm568_vm1, %v894_v13 }
 0x191   : > { %v1220_v25 = vpop.eup %1219  ;;  %915 = vst.msk [vmem:[%s1548_s11 + $0x50] sm:$0xff] %vm568_vm1, %v1218_v19  ;;  %v883_v23 = vsub.f32 %v1550_v40, %v1218_v19  ;;  %v897_v27 = vmul.f32 %v881_v21, %v1505_v32  ;;  %927 = vst.msk [vmem:[%s1559_s14 + $0x30] sm:$0xff] %vm568_vm1, %v895_v18 }
 0x192   : > { %v1222_v28 = vpop.eup %1221  ;;  %916 = vst.msk [vmem:[%s1548_s11 + $0x58] sm:$0xff] %vm568_vm1, %v1220_v25  ;;  %v884_v31 = vsub.f32 %v1550_v40, %v1220_v25  ;;  %v898_v30 = vmul.f32 %v882_v22, %v1508_v33  ;;  %928 = vst.msk [vmem:[%s1559_s14 + $0x38] sm:$0xff] %vm568_vm1, %v896_v20 }
 0x193   : > { %v1224_v47 = vpop.eup %1223  ;;  %917 = vst.msk [vmem:[%s1548_s11 + $0x60] sm:$0xff] %vm568_vm1, %v1222_v28  ;;  %v885_v32 = vsub.f32 %v1550_v40, %v1222_v28  ;;  %v899_v48 = vmul.f32 %v883_v23, %v1511_v51  ;;  %929 = vst.msk [vmem:[%s1559_s14 + $0x40] sm:$0xff] %vm568_vm1, %v897_v27 }
 0x194   : > { %v1226_v49 = vpop.eup %1225  ;;  %918 = vst.msk [vmem:[%s1548_s11 + $0x68] sm:$0xff] %vm568_vm1, %v1224_v47  ;;  %v886_v33 = vsub.f32 %v1550_v40, %v1224_v47  ;;  %v900_v50 = vmul.f32 %v884_v31, %v1514_v52  ;;  %930 = vst.msk [vmem:[%s1559_s14 + $0x48] sm:$0xff] %vm568_vm1, %v898_v30 }
 0x195   : > { %v1228_v57 = vpop.eup %1227  ;;  %919 = vst.msk [vmem:[%s1548_s11 + $0x70] sm:$0xff] %vm568_vm1, %v1226_v49  ;;  %v887_v51 = vsub.f32 %v1550_v40, %v1226_v49  ;;  %v901_v58 = vmul.f32 %v885_v32, %v1517_v53  ;;  %931 = vst.msk [vmem:[%s1559_s14 + $0x50] sm:$0xff] %vm568_vm1, %v899_v48 }
 0x196   : > { %920 = vst.msk [vmem:[%s1548_s11 + $0x78] sm:$0xff] %vm568_vm1, %v1228_v57  ;;  %v888_v59 = vsub.f32 %v1550_v40, %v1228_v57  ;;  %v902_v60 = vmul.f32 %v886_v33, %v1520_v54  ;;  %932 = vst.msk [vmem:[%s1559_s14 + $0x58] sm:$0xff] %vm568_vm1, %v900_v50 }
 0x197   : > { %v903_v52 = vmul.f32 %v887_v51, %v1523_v55  ;;  %933 = vst.msk [vmem:[%s1559_s14 + $0x60] sm:$0xff] %vm568_vm1, %v901_v58 }
 0x198   : > { %v904_v61 = vmul.f32 %v888_v59, %v1526_v56  ;;  %934 = vst.msk [vmem:[%s1559_s14 + $0x68] sm:$0xff] %vm568_vm1, %v902_v60 }
 0x199   : > { %935 = vst.msk [vmem:[%s1559_s14 + $0x70] sm:$0xff] %vm568_vm1, %v903_v52 }
 0x19a   : > { %936 = vst.msk [vmem:[%s1559_s14 + $0x78] sm:$0xff] %vm568_vm1, %v904_v61 }
 0x19b PF: > { %s21_s29 = sadd.s32 1, %s1235_s29  }
 0x19c   : > { %p18_p4 = scmp.ge.s32.totalorder %s21_s29, 4  }
 0x19e   :  { %20 = sbr.rel (!%p18_p4) target bundleno = 3 (0x3), region = 93 }

</bundles_post_ra>
